<compile_context>
chip_gen: v7x
topology: tpu7x:2x2x1
jax: 0.10.0
libtpu: 0.0.40
codegen_flags: <defaults>
</compile_context>

<pallas_src>
import numpy as np
import jax
import jax.numpy as jnp
from jax.experimental import pallas as pl
from jax.experimental.pallas import tpu as pltpu

STATE_DIM = 32
ACTION_DIM = 8
HIDDEN = 256
MAX_ACTION = 1.0
BATCH = 8                 # small example batch (padded internally to a sublane multiple)

USE_BF16 = True           # bf16 operands/output + f32 accumulation; False = exact f32
LANE = 128
PAD_OUT_TO_LANE = False   # True: pad W3/b3/out to 128 lanes (unmasked vst) -- benchmark
                          # against the default unpadded (TB, A) bf16 store at large B.


def _device_kind():
    try:
        return jax.devices()[0].device_kind.lower()
    except Exception:
        return ""


_KIND = _device_kind()
# Batch rows per grid step.  Sweep {512, 1024, 2048}; v5e kept smaller (single vst slot,
# f32 matmul results spill harder there).
BATCH_TILE = 256 if "v5" in _KIND else 1024


# ----------------------------------------------------------------------------
# Pallas kernel: full forward pass (3 MXU matmuls, f32 accumulation, fused epilogue)
# ----------------------------------------------------------------------------
def actor_kernel(x_ref, w1_ref, b1_ref, w2_ref, b2_ref, w3_ref, b3_ref, o_ref):
    # x arrives in its storage dtype (f32, tiny DMA); cast to the matmul operand dtype
    # in-kernel so the wrapper needs no per-call cast op.
    x = x_ref[...].astype(w1_ref.dtype)                                   # [TB, S]
    h1 = jnp.dot(x, w1_ref[...], preferred_element_type=jnp.float32)     # [TB, H] f32
    h1 = jnp.maximum(h1 + b1_ref[...], 0.0).astype(w2_ref.dtype)         # relu, bf16 live
    h2 = jnp.dot(h1, w2_ref[...], preferred_element_type=jnp.float32)    # [TB, H] f32
    h2 = jnp.maximum(h2 + b2_ref[...], 0.0).astype(w3_ref.dtype)         # relu, bf16 live
    h3 = jnp.dot(h2, w3_ref[...], preferred_element_type=jnp.float32)    # [TB, A] f32
    out = jnp.tanh(h3 + b3_ref[...])
    if MAX_ACTION != 1.0:                                                 # fold no-op *1.0
        out = MAX_ACTION * out
    o_ref[...] = out.astype(o_ref.dtype)                                  # bf16 store


# ----------------------------------------------------------------------------
# One-time parameter preparation (keep OUT of the per-call path)
# ----------------------------------------------------------------------------
def prepare_params(w1, b1, w2, b2, w3, b3):
    """Cast weights to the compute dtype and (optionally) pad the output layer to a full
    128-lane.  Call once; pass the result to actor_forward repeatedly."""
    cdt = jnp.bfloat16 if USE_BF16 else jnp.float32
    H, A = w3.shape
    if PAD_OUT_TO_LANE:
        A_pad = ((A + LANE - 1) // LANE) * LANE
        w3 = jnp.zeros((H, A_pad), w3.dtype).at[:, :A].set(w3)
        b3 = jnp.zeros((1, A_pad), b3.dtype).at[:, :A].set(b3)
    w1c, w2c, w3c = (w.astype(cdt) for w in (w1, w2, w3))
    b1c, b2c, b3c = (b.astype(jnp.float32) for b in (b1, b2, b3))
    return (w1c, b1c, w2c, b2c, w3c, b3c), A


# ----------------------------------------------------------------------------
# Wrapper: batch padding / tiling; weights VMEM-resident via constant index_maps
# ----------------------------------------------------------------------------
def actor_forward(x, prepared_params, action_dim):
    w1, b1, w2, b2, w3, b3 = prepared_params
    B, S = x.shape
    H = w1.shape[1]
    A_out = w3.shape[1]            # padded or real action dim

    # Pad batch to a sublane multiple; tile over the grid when large.
    B8 = ((B + 7) // 8) * 8
    if B8 <= BATCH_TILE:
        TB = B8
    else:
        TB = BATCH_TILE
        B8 = ((B8 + TB - 1) // TB) * TB
    if B8 != B:
        x = jnp.zeros((B8, S), x.dtype).at[:B, :].set(x)
    n_tiles = B8 // TB

    # x spec: deeper pipelining once there are enough tiles (residual DMA overlap).
    if n_tiles >= 3:
        x_spec = pl.BlockSpec((TB, S), lambda i: (i, 0), pipeline_mode=pl.Buffered(3))
    else:
        x_spec = pl.BlockSpec((TB, S), lambda i: (i, 0))

    # v7x: split the batch axis across both TensorCores; elsewhere plain "parallel".
    if "v7" in _KIND and n_tiles >= 2 and n_tiles % 2 == 0:
        dim_sem = (pltpu.CORE_PARALLEL,)
    else:
        dim_sem = ("parallel",)

    out_dtype = jnp.bfloat16 if USE_BF16 else jnp.float32

    out = pl.pallas_call(
        actor_kernel,
        out_shape=jax.ShapeDtypeStruct((B8, A_out), out_dtype),
        grid=(n_tiles,),
        in_specs=[
            x_spec,                                        # x: tiled over batch
            pl.BlockSpec((S, H), lambda i: (0, 0)),        # weights: constant block ->
            pl.BlockSpec((1, H), lambda i: (0, 0)),        # DMA'd once, VMEM-resident
            pl.BlockSpec((H, H), lambda i: (0, 0)),
            pl.BlockSpec((1, H), lambda i: (0, 0)),
            pl.BlockSpec((H, A_out), lambda i: (0, 0)),
            pl.BlockSpec((1, A_out), lambda i: (0, 0)),
        ],
        out_specs=pl.BlockSpec((TB, A_out), lambda i: (i, 0)),
        compiler_params=pltpu.CompilerParams(dimension_semantics=dim_sem),
    )(x, w1, b1, w2, b2, w3, b3)

    return out[:B, :action_dim].astype(jnp.float32)


# ----------------------------------------------------------------------------
# Deterministic parameter init (mirrors nn.init.orthogonal_ on PyTorch [out,in])
# ----------------------------------------------------------------------------
def orthogonal_init(key, out_dim, in_dim):
    rows, cols = out_dim, in_dim
    flat = jax.random.normal(key, (rows, cols), dtype=jnp.float32)
    transposed = rows < cols
    if transposed:
        flat = flat.T
    q, r = jnp.linalg.qr(flat)
    d = jnp.sign(jnp.diagonal(r))
    q = q * d[None, :]
    if transposed:
        q = q.T
    return q  # (out_dim, in_dim), like PyTorch layer.weight


def make_params(key):
    k1, k2, k3, kb1, kb2, kb3 = jax.random.split(key, 6)
    # PyTorch weights are [out, in]; kernel uses [in, out] -> transpose once here.
    w1 = orthogonal_init(k1, HIDDEN, STATE_DIM).T       # [S, H]
    w2 = orthogonal_init(k2, HIDDEN, HIDDEN).T          # [H, H]
    w3 = orthogonal_init(k3, ACTION_DIM, HIDDEN).T      # [H, A]
    b1 = jax.random.uniform(kb1, (1, HIDDEN), jnp.float32,
                            -1.0 / np.sqrt(STATE_DIM), 1.0 / np.sqrt(STATE_DIM))
    b2 = jax.random.uniform(kb2, (1, HIDDEN), jnp.float32,
                            -1.0 / np.sqrt(HIDDEN), 1.0 / np.sqrt(HIDDEN))
    b3 = jax.random.uniform(kb3, (1, ACTION_DIM), jnp.float32,
                            -1.0 / np.sqrt(HIDDEN), 1.0 / np.sqrt(HIDDEN))
    return w1, b1, w2, b2, w3, b3


def reference_forward(x, w1, b1, w2, b2, w3, b3):
    # Same precision regime as the kernel's matmuls (bf16 operands / f32 accum).
    cdt = jnp.bfloat16 if USE_BF16 else jnp.float32
    h1 = jnp.maximum(jnp.dot(x.astype(cdt), w1.astype(cdt),
                             preferred_element_type=jnp.float32) + b1, 0.0)
    h2 = jnp.maximum(jnp.dot(h1.astype(cdt), w2.astype(cdt),
                             preferred_element_type=jnp.float32) + b2, 0.0)
    h3 = jnp.dot(h2.astype(cdt), w3.astype(cdt),
                 preferred_element_type=jnp.float32) + b3
    return MAX_ACTION * jnp.tanh(h3)


if __name__ == "__main__":
    key = jax.random.PRNGKey(0)
    kx, kp = jax.random.split(key)
    x = jax.random.normal(kx, (BATCH, STATE_DIM), dtype=jnp.float32)
    raw_params = make_params(kp)

    prepared, A = prepare_params(*raw_params)   # one-time weight prep (not per call)
    out = actor_forward(x, prepared, A)
    out = jax.block_until_ready(out)

    ref = reference_forward(x, *raw_params)
    tol = 2e-2 if USE_BF16 else 1e-5            # bf16 output rounding + bf16 matmuls
    np.testing.assert_allclose(np.asarray(out), np.asarray(ref), rtol=tol, atol=tol)

    # TODO(synk): the `act()` method's in-place torch .normal_/.clamp noise sampling is
    # host-side RNG glue, not part of the forward hot path; omitted from the kernel.
    # TODO(synk): for repeated small-batch RL rollout, either batch many env states per
    # call or keep weights VMEM-resident across calls with a cross-pallas_call prefetch
    # (start the weight DMA in a prior call, return a DMA semaphore + VMEM ref,
    # has_side_effects=True) to hide the ~150 KB weight DMA behind intervening JAX work.
    print("KERNEL_OK")
</pallas_src>

<mosaic_0001>
module attributes {stable_mosaic.version = 11 : i64} {
  func.func @actor_kernel(%arg0: i32, %arg1: memref<8x32xf32, #tpu.memory_space<vmem>>, %arg2: memref<32x256xbf16, #tpu.memory_space<vmem>>, %arg3: memref<1x256xf32, #tpu.memory_space<vmem>>, %arg4: memref<256x256xbf16, #tpu.memory_space<vmem>>, %arg5: memref<1x256xf32, #tpu.memory_space<vmem>>, %arg6: memref<256x8xbf16, #tpu.memory_space<vmem>>, %arg7: memref<1x8xf32, #tpu.memory_space<vmem>>, %arg8: memref<8x8xbf16, #tpu.memory_space<vmem>>) attributes {dimension_semantics = [#tpu.dimension_semantics<parallel>], iteration_bounds = array<i64: 1>, scalar_prefetch = 0 : i64, scratch_operands = 0 : i64, tpu.core_type = #tpu.core_type<tc>, window_params = [{transform_indices = @transform_0, window_bounds = array<i64: 8, 32>}, {pipeline_mode = #tpu.pipeline_mode<synchronous>, transform_indices = @transform_1, window_bounds = array<i64: 32, 256>}, {pipeline_mode = #tpu.pipeline_mode<synchronous>, transform_indices = @transform_2, window_bounds = array<i64: 1, 256>}, {pipeline_mode = #tpu.pipeline_mode<synchronous>, transform_indices = @transform_3, window_bounds = array<i64: 256, 256>}, {pipeline_mode = #tpu.pipeline_mode<synchronous>, transform_indices = @transform_4, window_bounds = array<i64: 1, 256>}, {pipeline_mode = #tpu.pipeline_mode<synchronous>, transform_indices = @transform_5, window_bounds = array<i64: 256, 8>}, {pipeline_mode = #tpu.pipeline_mode<synchronous>, transform_indices = @transform_6, window_bounds = array<i64: 1, 8>}, {transform_indices = @transform_7, window_bounds = array<i64: 8, 8>}]} {
    %c0 = arith.constant 0 : index
    %c0_0 = arith.constant 0 : index
    %0 = vector.load %arg1[%c0, %c0_0] : memref<8x32xf32, #tpu.memory_space<vmem>>, vector<8x32xf32>
    %1 = arith.truncf %0 : vector<8x32xf32> to vector<8x32xbf16>
    %c0_1 = arith.constant 0 : index
    %c0_2 = arith.constant 0 : index
    %2 = vector.load %arg2[%c0_1, %c0_2] : memref<32x256xbf16, #tpu.memory_space<vmem>>, vector<32x256xbf16>
    %cst = arith.constant dense<0.000000e+00> : vector<8x256xf32>
    %3 = tpu.matmul %1, %2, %cst {dimension_numbers = #tpu.dot_dimension_numbers<[1], [0], [0], [1], [0, 0, 1, 1], [], []>} : vector<8x32xbf16>, vector<32x256xbf16>, vector<8x256xf32> -> vector<8x256xf32>
    %c0_3 = arith.constant 0 : index
    %c0_4 = arith.constant 0 : index
    %4 = vector.load %arg3[%c0_3, %c0_4] : memref<1x256xf32, #tpu.memory_space<vmem>>, vector<1x256xf32>
    %5 = vector.broadcast %4 : vector<1x256xf32> to vector<8x256xf32>
    %6 = arith.addf %3, %5 : vector<8x256xf32>
    %cst_5 = arith.constant 0.000000e+00 : f32
    %7 = vector.broadcast %cst_5 : f32 to vector<8x256xf32>
    %8 = arith.maximumf %6, %7 : vector<8x256xf32>
    %9 = arith.truncf %8 : vector<8x256xf32> to vector<8x256xbf16>
    %c0_6 = arith.constant 0 : index
    %c0_7 = arith.constant 0 : index
    %10 = vector.load %arg4[%c0_6, %c0_7] : memref<256x256xbf16, #tpu.memory_space<vmem>>, vector<256x256xbf16>
    %cst_8 = arith.constant dense<0.000000e+00> : vector<8x256xf32>
    %11 = tpu.matmul %9, %10, %cst_8 {dimension_numbers = #tpu.dot_dimension_numbers<[1], [0], [0], [1], [0, 0, 1, 1], [], []>} : vector<8x256xbf16>, vector<256x256xbf16>, vector<8x256xf32> -> vector<8x256xf32>
    %c0_9 = arith.constant 0 : index
    %c0_10 = arith.constant 0 : index
    %12 = vector.load %arg5[%c0_9, %c0_10] : memref<1x256xf32, #tpu.memory_space<vmem>>, vector<1x256xf32>
    %13 = vector.broadcast %12 : vector<1x256xf32> to vector<8x256xf32>
    %14 = arith.addf %11, %13 : vector<8x256xf32>
    %cst_11 = arith.constant 0.000000e+00 : f32
    %15 = vector.broadcast %cst_11 : f32 to vector<8x256xf32>
    %16 = arith.maximumf %14, %15 : vector<8x256xf32>
    %17 = arith.truncf %16 : vector<8x256xf32> to vector<8x256xbf16>
    %c0_12 = arith.constant 0 : index
    %c0_13 = arith.constant 0 : index
    %18 = vector.load %arg6[%c0_12, %c0_13] : memref<256x8xbf16, #tpu.memory_space<vmem>>, vector<256x8xbf16>
    %cst_14 = arith.constant dense<0.000000e+00> : vector<8x8xf32>
    %19 = tpu.matmul %17, %18, %cst_14 {dimension_numbers = #tpu.dot_dimension_numbers<[1], [0], [0], [1], [0, 0, 1, 1], [], []>} : vector<8x256xbf16>, vector<256x8xbf16>, vector<8x8xf32> -> vector<8x8xf32>
    %c0_15 = arith.constant 0 : index
    %c0_16 = arith.constant 0 : index
    %20 = vector.load %arg7[%c0_15, %c0_16] : memref<1x8xf32, #tpu.memory_space<vmem>>, vector<1x8xf32>
    %21 = vector.broadcast %20 : vector<1x8xf32> to vector<8x8xf32>
    %22 = arith.addf %19, %21 : vector<8x8xf32>
    %23 = math.tanh %22 : vector<8x8xf32>
    %24 = arith.truncf %23 : vector<8x8xf32> to vector<8x8xbf16>
    %c0_17 = arith.constant 0 : index
    %c0_18 = arith.constant 0 : index
    %25 = vector.load %arg8[%c0_17, %c0_18] : memref<8x8xbf16, #tpu.memory_space<vmem>>, vector<8x8xbf16>
    tpu.vector_store %arg8[%c0_17, %c0_18], %24 {strides = array<i32>} : memref<8x8xbf16, #tpu.memory_space<vmem>>, vector<8x8xbf16>,
    return
  }
  func.func @transform_0(%arg0: i32) -> (i32, i32) {
    %c0_i32 = arith.constant 0 : i32
    %c0_i32_0 = arith.constant 0 : i32
    return %arg0, %c0_i32 : i32, i32
  }
  func.func @transform_1(%arg0: i32) -> (i32, i32) {
    %c0_i32 = arith.constant 0 : i32
    %c0_i32_0 = arith.constant 0 : i32
    %c0_i32_1 = arith.constant 0 : i32
    return %c0_i32, %c0_i32_0 : i32, i32
  }
  func.func @transform_2(%arg0: i32) -> (i32, i32) {
    %c0_i32 = arith.constant 0 : i32
    %c0_i32_0 = arith.constant 0 : i32
    %c0_i32_1 = arith.constant 0 : i32
    return %c0_i32, %c0_i32_0 : i32, i32
  }
  func.func @transform_3(%arg0: i32) -> (i32, i32) {
    %c0_i32 = arith.constant 0 : i32
    %c0_i32_0 = arith.constant 0 : i32
    %c0_i32_1 = arith.constant 0 : i32
    return %c0_i32, %c0_i32_0 : i32, i32
  }
  func.func @transform_4(%arg0: i32) -> (i32, i32) {
    %c0_i32 = arith.constant 0 : i32
    %c0_i32_0 = arith.constant 0 : i32
    %c0_i32_1 = arith.constant 0 : i32
    return %c0_i32, %c0_i32_0 : i32, i32
  }
  func.func @transform_5(%arg0: i32) -> (i32, i32) {
    %c0_i32 = arith.constant 0 : i32
    %c0_i32_0 = arith.constant 0 : i32
    %c0_i32_1 = arith.constant 0 : i32
    return %c0_i32, %c0_i32_0 : i32, i32
  }
  func.func @transform_6(%arg0: i32) -> (i32, i32) {
    %c0_i32 = arith.constant 0 : i32
    %c0_i32_0 = arith.constant 0 : i32
    %c0_i32_1 = arith.constant 0 : i32
    return %c0_i32, %c0_i32_0 : i32, i32
  }
  func.func @transform_7(%arg0: i32) -> (i32, i32) {
    %c0_i32 = arith.constant 0 : i32
    %c0_i32_0 = arith.constant 0 : i32
    return %arg0, %c0_i32 : i32, i32
  }
}

</mosaic_0001>

<bundles_post_ra>
// kernel: tpu_custom_call.1
= control target key start
LH: loop header
LB: loop body
LE: loop exit
PB: predicated region body
PF: predicated region fallthrough
CT: control target
= control target key end

     0   :  { %12 = vsyncpa [#allocation3], 0  ;;  %s914_s0 = inlined_call_operand.vmem [shape: f32[8,32], index: 0, kind: input, shape index: {}]   ;;  %s915_s1 = inlined_call_operand.vmem [shape: bf16[32,256], index: 1, kind: input, shape index: {}]   ;;  %s916_s2 = inlined_call_operand.vmem [shape: f32[1,256], index: 2, kind: input, shape index: {}]   ;;  %s917_s3 = inlined_call_operand.hbm [shape: bf16[256,256], index: 3, kind: input, shape index: {}]   ;;  %s918_s4 = inlined_call_operand.vmem [shape: f32[1,256], index: 4, kind: input, shape index: {}]   ;;  %s919_s5 = inlined_call_operand.vmem [shape: bf16[256,8], index: 5, kind: input, shape index: {}]   ;;  %s920_s6 = inlined_call_operand.vmem [shape: f32[1,8], index: 6, kind: input, shape index: {}]   ;;  %s921_s7 = inlined_call_operand.hbm [shape: bf16[8,8], index: 7, kind: output, shape index: {}]  }
   0x1   :  { %13 = vsyncpa [#allocation4], 0  ;;  %s773_s24 = smov [#allocation2]   ;;  %s725_s28 = scalar_lea.hbm %s917_s3, 4096 }
   0x2   :  { %s25_s25 = sshll.u32 %s773_s24, 4  ;;  %p726_p0 = scmp.ne.s32.totalorder %s917_s3, %s725_s28  ;;  %s26_s25 = int_to_ptr.vmem [resolvable:$true] %s25_s25 }
   0x3   :  { %p729_p1 = scmp.lt.u32.totalorder %s725_s28, %s917_s3 }
   0x5   :  { %p731_p2 = pnand %p729_p1, %p726_p0 }
   0x7   :  { %734 = shalt.err (!%p731_p2)
}
   0x8   :  { %s735_s10 = scalar_lea.vmem %s26_s25, 4096  ;;  %p740_p4 = scmp.lt.s32.totalorder %s26_s25, %s26_s25 }
   0x9   :  { %p736_p3 = scmp.ne.s32.totalorder %s26_s25, %s735_s10  ;;  %p741_p5 = scmp.lt.s32.totalorder %s735_s10, %s735_s10 }
   0xb   :  { %p742_p6 = por %p741_p5, %p740_p4 }
   0xd   :  { %p743_p7 = pnand %p742_p6, %p736_p3 }
   0xf   :  { %746 = shalt.err (!%p743_p7)
}
  0x10   :  { %s774_s11 = smov 128   ;;  %s775_s12 = smov 8  }
  0x11   :  { %31 = dma.hbm_to_vmem [thread:$0]  %s917_s3, 4096, %s26_s25, [#allocation3], %s774_s11, %s774_s11, %s775_s12  }
  0x12   :  { %769 = dma.done.wait [#allocation3], 4096  }
  0x13   :  { %770 = vsyncadd [#allocation3], 4294963200  ;;  %v776_v0 = vmov 0   ;;  %v653_v1 = vld [vmem:[%s915_s1 + $0x4] ss:$8 sps:$4 sm:$0xff]   ;;  %vm80_vm0 = vcmask 261120   ;;  %v50_v51 = vlaneseq }
  0x14   :  { %116 = vmatprep.mubr.bf16.mxu0 %v776_v0  ;;  %v655_v2 = vld [vmem:[%s915_s1] ss:$8 sps:$4 sm:$0xff]   ;;  %84 = vmatprep.subr.bf16.mxu0 %v653_v1  ;;  %v656_v3 = vld [vmem:[%s915_s1 + $0x14] ss:$8 sps:$4 sm:$0xff]   ;;  %v658_v4 = vld [vmem:[%s915_s1 + $0x10] ss:$8 sps:$4 sm:$0xff]  }
  0x15   :  { %v42_v5 = vld [vmem:[%s914_s0] sm:$0xff]  ;;  %85 = vmatpush1.bf16.msra.mxu0 %v655_v2  ;;  %v662_v8 = vld [vmem:[#allocation2 + $0x14] ss:$8 sps:$4 sm:$0xff]   ;;  %v664_v10 = vld [vmem:[#allocation2 + $0x10] ss:$8 sps:$4 sm:$0xff]   ;;  %v51_v52 = vshrl.u32 %v50_v51, 7 }
  0x16   :  { %v659_v6 = vld [vmem:[#allocation2 + $0x4] ss:$8 sps:$4 sm:$0xff]   ;;  %86 = vmatprep.subr.bf16.mxu0 %v656_v3  ;;  %v661_v7 = vld [vmem:[#allocation2] ss:$8 sps:$4 sm:$0xff]   ;;  %v43_v9 = vpack.c.bf16 %v42_v5, %v42_v5  ;;  %v668_v13 = vld [vmem:[#allocation2 + $0x34] ss:$8 sps:$4 sm:$0xff]  }
  0x17   :  { %333 = vmatprep.subr.bf16.mxu1 %v659_v6  ;;  %v665_v11 = vld [vmem:[#allocation2 + $0x24] ss:$8 sps:$4 sm:$0xff]   ;;  %v667_v12 = vld [vmem:[#allocation2 + $0x20] ss:$8 sps:$4 sm:$0xff]   ;;  %v670_v14 = vld [vmem:[#allocation2 + $0x30] ss:$8 sps:$4 sm:$0xff]  }
  0x18   :  { %334 = vmatpush1.bf16.msra.mxu1 %v661_v7  ;;  %v671_v15 = vld [vmem:[#allocation2 + $0x44] ss:$8 sps:$4 sm:$0xff]   ;;  %v673_v16 = vld [vmem:[#allocation2 + $0x40] ss:$8 sps:$4 sm:$0xff]   ;;  %v674_v17 = vld [vmem:[#allocation2 + $0x54] ss:$8 sps:$4 sm:$0xff]  }
  0x19   :  { %87 = vmatpush1.bf16.msra.mxu0 %v658_v4  ;;  %335 = vmatprep.subr.bf16.mxu1 %v662_v8  ;;  %v676_v18 = vld [vmem:[#allocation2 + $0x50] ss:$8 sps:$4 sm:$0xff]   ;;  %v677_v19 = vld [vmem:[#allocation2 + $0x64] ss:$8 sps:$4 sm:$0xff]   ;;  %v679_v20 = vld [vmem:[#allocation2 + $0x60] ss:$8 sps:$4 sm:$0xff]  }
  0x1a   :  { %v680_v21 = vld [vmem:[#allocation2 + $0x74] ss:$8 sps:$4 sm:$0xff]   ;;  %v682_v22 = vld [vmem:[#allocation2 + $0x70] ss:$8 sps:$4 sm:$0xff]   ;;  %v683_v23 = vld [vmem:[#allocation2 + $0x84] ss:$8 sps:$4 sm:$0xff]  }
  0x1b   :  { %v685_v24 = vld [vmem:[#allocation2 + $0x80] ss:$8 sps:$4 sm:$0xff]   ;;  %v686_v25 = vld [vmem:[#allocation2 + $0x94] ss:$8 sps:$4 sm:$0xff]   ;;  %v688_v26 = vld [vmem:[#allocation2 + $0x90] ss:$8 sps:$4 sm:$0xff]  }
  0x1c   :  { %576 = vmatmul.mubr.msk.bf16.vlgmr.msra.gmra.mrb[0].mxu0 %vm80_vm0, %v43_v9  ;;  %336 = vmatpush1.bf16.msra.mxu1 %v664_v10  ;;  %v689_v27 = vld [vmem:[#allocation2 + $0xa4] ss:$8 sps:$4 sm:$0xff]   ;;  %v691_v28 = vld [vmem:[#allocation2 + $0xa0] ss:$8 sps:$4 sm:$0xff]   ;;  %v692_v29 = vld [vmem:[#allocation2 + $0xb4] ss:$8 sps:$4 sm:$0xff]  }
  0x1d   :  { %337 = vmatprep.subr.bf16.mxu1 %v665_v11  ;;  %v694_v30 = vld [vmem:[#allocation2 + $0xb0] ss:$8 sps:$4 sm:$0xff]   ;;  %v695_v31 = vld [vmem:[#allocation2 + $0xc4] ss:$8 sps:$4 sm:$0xff]   ;;  %v697_v32 = vld [vmem:[#allocation2 + $0xc0] ss:$8 sps:$4 sm:$0xff]  }
  0x1e   :  { %v698_v33 = vld [vmem:[#allocation2 + $0xd4] ss:$8 sps:$4 sm:$0xff]   ;;  %v700_v34 = vld [vmem:[#allocation2 + $0xd0] ss:$8 sps:$4 sm:$0xff]   ;;  %v701_v35 = vld [vmem:[#allocation2 + $0xe4] ss:$8 sps:$4 sm:$0xff]  }
  0x1f   :  { %v703_v36 = vld [vmem:[#allocation2 + $0xe0] ss:$8 sps:$4 sm:$0xff]   ;;  %v704_v37 = vld [vmem:[#allocation2 + $0xf4] ss:$8 sps:$4 sm:$0xff]   ;;  %v706_v38 = vld [vmem:[#allocation2 + $0xf0] ss:$8 sps:$4 sm:$0xff]  }
  0x20   :  { %338 = vmatpush1.bf16.msra.mxu1 %v667_v12  ;;  %v707_v39 = vld [vmem:[%s919_s5 + $0x40] sm:$0xff]   ;;  %v709_v41 = vld [vmem:[%s919_s5 + $0x48] sm:$0xff]   ;;  %v711_v43 = vld [vmem:[%s919_s5 + $0x50] sm:$0xff]   ;;  %v52_v53 = vsub.s32 0, %v51_v52  ;;  %v56_v55 = vsub.s32 1, %v51_v52  ;;  %vm555_vm1 = vcmask 60416  }
  0x21   :  { %339 = vmatprep.subr.bf16.mxu1 %v668_v13  ;;  %v708_v40 = vld [vmem:[%s919_s5] sm:$0xff]   ;;  %626 = vmatprep.subr.bf16.mxu0 %v707_v39  ;;  %v710_v42 = vld [vmem:[%s919_s5 + $0x8] sm:$0xff]   ;;  %v712_v44 = vld [vmem:[%s919_s5 + $0x10] sm:$0xff]  }
  0x22   :  { %627 = vmatpush3.bf16.msra.mxu0 %v708_v40  ;;  %v713_v45 = vld [vmem:[%s919_s5 + $0x58] sm:$0xff]   ;;  %v715_v47 = vld [vmem:[%s919_s5 + $0x60] sm:$0xff]   ;;  %v717_v49 = vld [vmem:[%s919_s5 + $0x68] sm:$0xff]  }
  0x23   :  { %628 = vmatprep.subr.bf16.mxu0 %v709_v41  ;;  %v714_v46 = vld [vmem:[%s919_s5 + $0x18] sm:$0xff]   ;;  %v716_v48 = vld [vmem:[%s919_s5 + $0x20] sm:$0xff]   ;;  %v718_v50 = vld [vmem:[%s919_s5 + $0x28] sm:$0xff]  }
  0x24   :  { %340 = vmatpush1.bf16.msra.mxu1 %v670_v14  ;;  %v48_v54 = vld [vmem:[%s916_s2] sm:$0x3]  ;;  %v719_v4 = vld [vmem:[%s919_s5 + $0x70] sm:$0xff]   ;;  %v721_v6 = vld [vmem:[%s919_s5 + $0x78] sm:$0xff]  }
  0x25   :  { %341 = vmatprep.subr.bf16.mxu1 %v671_v15  ;;  %v53_v56 = vrot.slane %v48_v54, %v52_v53  ;;  %v57_v57 = vrot.slane %v48_v54, %v56_v55  ;;  %v720_v5 = vld [vmem:[%s919_s5 + $0x30] sm:$0xff]   ;;  %v722_v7 = vld [vmem:[%s919_s5 + $0x38] sm:$0xff]   ;;  %v161_v8 = vld [vmem:[%s918_s4] sm:$0x3]  ;;  %s777_s4 = smov [#allocation5]  }
  0x26   :  { %629 = vmatpush3.bf16.msra.mxu0 %v710_v42  ;;  %v166_v9 = vrot.slane %v161_v8, %v52_v53  ;;  %v170_v10 = vrot.slane %v161_v8, %v56_v55  ;;  %s563_s9 = sshll.u32 %s777_s4, 4  ;;  %s564_s9 = int_to_ptr.vmem [resolvable:$true] %s563_s9 }
  0x27   :  { %630 = vmatprep.subr.bf16.mxu0 %v711_v43  ;;  %s747_s10 = scalar_lea.vmem %s564_s9, 64  ;;  %p752_p9 = scmp.lt.s32.totalorder %s564_s9, %s564_s9 }
  0x28   :  { %342 = vmatpush1.bf16.msra.mxu1 %v673_v16  ;;  %p748_p8 = scmp.ne.s32.totalorder %s564_s9, %s747_s10  ;;  %p753_p10 = scmp.lt.s32.totalorder %s747_s10, %s747_s10 }
  0x29   :  { %343 = vmatprep.subr.bf16.mxu1 %v674_v17 }
  0x2a   :  { %631 = vmatpush3.bf16.msra.mxu0 %v712_v44  ;;  %p754_p11 = por %p753_p10, %p752_p9 }
  0x2b   :  { %632 = vmatprep.subr.bf16.mxu0 %v713_v45 }
  0x2c   :  { %344 = vmatpush1.bf16.msra.mxu1 %v676_v18  ;;  %p755_p12 = pnand %p754_p11, %p748_p8 }
  0x2d   :  { %345 = vmatprep.subr.bf16.mxu1 %v677_v19 }
  0x2e   :  { %633 = vmatpush3.bf16.msra.mxu0 %v714_v46 }
  0x2f   :  { %634 = vmatprep.subr.bf16.mxu0 %v715_v47 }
  0x30   :  { %346 = vmatpush1.bf16.msra.mxu1 %v679_v20 }
  0x31   :  { %347 = vmatprep.subr.bf16.mxu1 %v680_v21 }
  0x32   :  { %635 = vmatpush3.bf16.msra.mxu0 %v716_v48 }
  0x33   :  { %636 = vmatprep.subr.bf16.mxu0 %v717_v49 }
  0x34   :  { %348 = vmatpush1.bf16.msra.mxu1 %v682_v22  ;;  %v609_v22 = vld [vmem:[%s920_s6] ss:$0 sm:$0xff] }
  0x35   :  { %349 = vmatprep.subr.bf16.mxu1 %v683_v23 }
  0x36   :  { %637 = vmatpush3.bf16.msra.mxu0 %v718_v50 }
  0x37   :  { %638 = vmatprep.subr.bf16.mxu0 %v719_v4 }
  0x38   :  { %350 = vmatpush1.bf16.msra.mxu1 %v685_v24 }
  0x39   :  { %351 = vmatprep.subr.bf16.mxu1 %v686_v25 }
  0x3a   :  { %639 = vmatpush3.bf16.msra.mxu0 %v720_v5 }
  0x3b   :  { %640 = vmatprep.subr.bf16.mxu0 %v721_v6 }
  0x3c   :  { %352 = vmatpush1.bf16.msra.mxu1 %v688_v26 }
  0x3d   :  { %353 = vmatprep.subr.bf16.mxu1 %v689_v27 }
  0x3e   :  { %641 = vmatpush3.bf16.msra.mxu0 %v722_v7 }
  0x40   :  { %354 = vmatpush1.bf16.msra.mxu1 %v691_v28 }
  0x41   :  { %355 = vmatprep.subr.bf16.mxu1 %v692_v29 }
  0x44   :  { %356 = vmatpush1.bf16.msra.mxu1 %v694_v30 }
  0x45   :  { %357 = vmatprep.subr.bf16.mxu1 %v695_v31 }
  0x48   :  { %358 = vmatpush1.bf16.msra.mxu1 %v697_v32 }
  0x49   :  { %359 = vmatprep.subr.bf16.mxu1 %v698_v33 }
  0x4c   :  { %360 = vmatpush1.bf16.msra.mxu1 %v700_v34 }
  0x4d   :  { %361 = vmatprep.subr.bf16.mxu1 %v701_v35 }
  0x50   :  { %362 = vmatpush1.bf16.msra.mxu1 %v703_v36 }
  0x51   :  { %363 = vmatprep.subr.bf16.mxu1 %v704_v37 }
  0x54   :  { %364 = vmatpush1.bf16.msra.mxu1 %v706_v38 }
  0xef   :  { %v118_v58 = vpop.f32.mrb[0].mxu0 }
  0xf0   :  { %v119_v59 = vadd.f32 %v118_v58, %v53_v56  ;;  %v120_v60 = vpop.f32.mrb[1].mxu0 }
  0xf1   :  { %v121_v61 = vadd.f32 %v120_v60, %v57_v57  ;;  %v122_v62 = vpop.f32.mrb[2].mxu0 }
  0xf2   :  { %v125_v63 = vmax.f32 %v119_v59, 0.0  ;;  %v123_v0 = vpop.f32.mrb[3].mxu0 }
  0xf3   :  { %v126_v1 = vmax.f32 %v121_v61, 0.0 }
  0xf4   :  { %v127_v3 = vpack.c.bf16 %v125_v63, %v125_v63 }
  0xf5   :  { %v128_v2 = vpack.c.bf16 %v126_v1, %v126_v1 }
  0xf7   :  { %365 = vmatprep.mubr.bf16.mxu1 %v128_v2 }
  0xf8   :  { %366 = vmatmul.mubr.bf16.vlgmr.msra.gmra.mrb[0].mxu1 %v127_v3 }
 0x1cb   :  { %v367_v11 = vpop.f32.mrb[0].mxu1 }
 0x1cc   :  { %v368_v12 = vadd.f32 %v367_v11, %v166_v9  ;;  %v369_v13 = vpop.f32.mrb[1].mxu1 }
 0x1cd   :  { %v370_v14 = vadd.f32 %v369_v13, %v170_v10  ;;  %v371_v15 = vpop.f32.mrb[2].mxu1 }
 0x1ce   :  { %v374_v16 = vmax.f32 %v368_v12, 0.0  ;;  %v372_v17 = vpop.f32.mrb[3].mxu1 }
 0x1cf   :  { %v375_v18 = vmax.f32 %v370_v14, 0.0 }
 0x1d0   :  { %v376_v20 = vpack.c.bf16 %v374_v16, %v374_v16 }
 0x1d1   :  { %v377_v19 = vpack.c.bf16 %v375_v18, %v375_v18 }
 0x1d3   :  { %545 = vmatprep.mubr.bf16.mxu0 %v377_v19 }
 0x1d4   :  { %546 = vmatmul.mubr.bf16.vlgmr.msra.gmra.mrb[4].mxu0 %v376_v20 }
 0x2a7   :  { %v642_v21 = vpop.f32.mrb[4].mxu0 }
 0x2a8   :  { %v643_v23 = vpop.f32.mrb[5].mxu0 }
 0x2a9   :  { %v644_v24 = vadd.f32 %v643_v23, %v642_v21  ;;  %v645_v25 = vpop.f32.mrb[6].mxu0 }
 0x2aa   :  { %v646_v26 = vpop.f32.mrb[7].mxu0 }
 0x2ab   :  { %v548_v27 = vadd.f32 %v644_v24, %v609_v22 }
 0x2ad   :  { %723 = vtanh.f32 %v548_v27 }
 0x2b7   :  { %v724_v28 = vpop.eup %723 }
 0x2b8   :  { %v554_v29 = vpack.c.bf16 %v724_v28, %v724_v28 }
 0x2ba   :  { %556 = vst.msk [vmem:[#allocation5] sm:$0xf] %vm555_vm1, %v554_v29 }
 0x2bb   :  { %758 = shalt.err (!%p755_p12)
}
 0x2bc   :  { %s759_s12 = scalar_lea.hbm %s921_s7, 64 }
 0x2bd   :  { %p760_p13 = scmp.ne.s32.totalorder %s921_s7, %s759_s12  ;;  %p763_p0 = scmp.lt.u32.totalorder %s759_s12, %s921_s7 }
 0x2bf   :  { %p765_p1 = pnand %p763_p0, %p760_p13 }
 0x2c1   :  { %768 = shalt.err (!%p765_p1)
}
 0x2c2   :  { %566 = dma.vmem_to_hbm [thread:$0]  %s564_s9, 64, %s921_s7, [#allocation4]  }
 0x2c3   :  { %771 = dma.done.wait [#allocation4], 64  }
 0x2c4   :  { %772 = vsyncadd [#allocation4], 4294967232 }
 0x2c5   :  { %570 = vsyncpa [#allocation3], 1 }
 0x2c6   :  { %571 = vsyncpa [#allocation4], 1 }

</bundles_post_ra>
